<compile_context>
chip_gen: v7x
topology: tpu7x:2x2x1
jax: 0.10.0
libtpu: 0.0.40
codegen_flags: <defaults>
</compile_context>

<pallas_src>
import jax
import jax.numpy as jnp
from jax.experimental import pallas as pl
from jax.experimental.pallas import tpu as pltpu


def attention_kernel(x_ref, wt_ref, r_ref, aw_ref):
    # x_ref : (TB, T, H) slab of batch rows
    # wt_ref: (H, 1)     Linear(H, 1, bias=False) weight, pre-transposed, resident
    TB, T, H = x_ref.shape
    x = x_ref[...]                                        # (TB, T, H)
    wt = wt_ref[...]                                      # (H, 1)

    # ---- scores on the MXU: (TB*T, H) @ (H, 1) -> (TB*T, 1) ----------------
    xt2 = jnp.tanh(x).reshape(TB * T, H)                  # EUP tanh, leading-dim collapse
    scores = jnp.dot(xt2, wt, preferred_element_type=jnp.float32)   # (TB*T, 1)
    scores = scores.reshape(TB, T, 1)                     # sublane-major T (no transpose)

    # ---- softmax over time (PyTorch dim=1), stats kept sublane-major -------
    m = jnp.max(scores, axis=1, keepdims=True)            # (TB, 1, 1)
    e = jnp.exp(scores - m)                               # (TB, T, 1)
    l = jnp.sum(e, axis=1, keepdims=True)                 # (TB, 1, 1)
    inv = pl.reciprocal(l, approx=True)                   # EUP vrcp (free slot)
    inv = inv * (2.0 - l * inv)                           # one Newton step -> ~f32 accuracy
    p = e * inv                                           # (TB, T, 1)

    # ---- weighted sum: VPU multiply (lane-broadcast of p) + sublane reduce --
    # No MXU 1-row matmuls, no transpose of p into the x-sized tensor path.
    attn_r = jnp.sum(x.astype(jnp.float32) * p, axis=1)   # (TB, H)

    r_ref[...] = attn_r.astype(r_ref.dtype)               # (TB, H), lane-dense store
    aw_ref[...] = p.reshape(TB, T).astype(aw_ref.dtype)   # (TB, T), one small relayout


def _vmem_capacity_bytes():
    """Per-core VMEM capacity; conservative v7x default if the query fails."""
    try:
        info = pltpu.get_tpu_info()
        cap = getattr(info, "vmem_capacity_bytes", None)
        if cap:
            return int(cap)
    except Exception:
        pass
    return 64 * 1024 * 1024


def _pick_batch_tile(B, T, H, itemsize, budget_bytes):
    """Batch tile: fits the x-slab budget, keeps >=2 (ideally >=4) grid steps,
    and is a multiple of 8 (sublane axis of the 2-D outputs) unless TB == B."""
    row_bytes = max(T * H * itemsize, 1)
    tb = max(1, budget_bytes // row_bytes)
    if B >= 32:
        tb = min(tb, B // 4)        # >=4 steps: megacore sharding + pipeline overlap
    elif B >= 16:
        tb = min(tb, B // 2)        # >=2 steps: megacore sharding
    if tb >= B:
        return B                    # single full block — exempt from the 8-multiple rule
    # (8,128) rule: TB sits on the sublane axis of the (TB, H)/(TB, T) out blocks.
    tb = max(8, (tb // 8) * 8)
    # TODO(synk): for very long sequences (8 rows of T*H*4B already >> budget) add a
    # second "arbitrary" grid axis over T with an online softmax to bound VMEM.
    return min(tb, B)


def attention_layer(x, w):
    """x: (B, T, H); w: (1, H) Linear weight -> (attn_r (B, H), attn_w (B, T))."""
    B, T, H = x.shape

    vmem_cap = _vmem_capacity_bytes()
    # 3/4 of physical VMEM: 48 MiB on v7x (64 MiB/TC), 96 MiB on v5e/v6e (128 MiB).
    vmem_limit = int((vmem_cap * 3) // 4)
    # x-slab budget: ~1/6 of VMEM (double-buffered input + tanh/product temps must
    # all fit under vmem_limit).  ~10.6 MiB on v7x, 16 MiB on v5e/v6e.
    budget = min(16 << 20, vmem_cap // 6)

    TB = _pick_batch_tile(B, T, H, x.dtype.itemsize, budget)
    grid = (pl.cdiv(B, TB),)

    w_t = jnp.transpose(w)          # (H, 1): hoisted out of the kernel, done once

    return pl.pallas_call(
        attention_kernel,
        out_shape=(
            jax.ShapeDtypeStruct((B, H), x.dtype),
            jax.ShapeDtypeStruct((B, T), x.dtype),
        ),
        grid_spec=pltpu.PrefetchScalarGridSpec(
            num_scalar_prefetch=0,
            grid=grid,
            in_specs=[
                pl.BlockSpec((TB, T, H), lambda b: (b, 0, 0)),
                pl.BlockSpec((H, 1), lambda b: (0, 0)),
            ],
            out_specs=[
                pl.BlockSpec((TB, H), lambda b: (b, 0)),
                pl.BlockSpec((TB, T), lambda b: (b, 0)),
            ],
        ),
        compiler_params=pltpu.CompilerParams(
            dimension_semantics=("parallel",),      # megacore-shard batch blocks (v7x)
            vmem_limit_bytes=vmem_limit,            # generation-aware
        ),
        cost_estimate=pl.CostEstimate(
            flops=4 * B * T * H,                     # MXU scores + weighted sum
            transcendentals=B * T * (H + 1) + B,     # tanh + exp + rcp
            bytes_accessed=(B * T * H + B * H + B * T + H) * x.dtype.itemsize,
        ),
    )(x, w_t)


def _reference(x, w):
    # pure-JAX reference mirroring the PyTorch forward
    scores = jnp.einsum("bth,oh->bto", jnp.tanh(x), w)     # (B, T, 1)
    attn_w = jax.nn.softmax(scores, axis=1)                # (B, T, 1)
    attn_r = jnp.einsum("bth,bto->bho", x, attn_w)         # (B, H, 1)
    return attn_r[..., 0], attn_w[..., 0]


if __name__ == "__main__":
    B, T, H = 2, 8, 32
    key = jax.random.PRNGKey(0)
    kx, kw = jax.random.split(key)

    x = jax.random.normal(kx, (B, T, H), dtype=jnp.float32)
    # nn.Linear(H, 1, bias=False): weight shape (1, H), U(-1/sqrt(H), 1/sqrt(H))
    bound = 1.0 / (H ** 0.5)
    w = jax.random.uniform(kw, (1, H), minval=-bound, maxval=bound,
                           dtype=jnp.float32)

    attn_r, attn_w = attention_layer(x, w)
    jax.block_until_ready((attn_r, attn_w))

    ref_r, ref_w = _reference(x, w)
    assert attn_r.shape == (B, H) and attn_w.shape == (B, T)
    assert jnp.allclose(attn_r, ref_r, atol=1e-5, rtol=1e-4)
    assert jnp.allclose(attn_w, ref_w, atol=1e-5, rtol=1e-4)

    print("KERNEL_OK")
</pallas_src>

<mosaic_0001>
module attributes {stable_mosaic.version = 11 : i64} {
  func.func @attention_kernel(%arg0: i32, %arg1: memref<2x8x32xf32, #tpu.memory_space<vmem>>, %arg2: memref<32x1xf32, #tpu.memory_space<vmem>>, %arg3: memref<2x32xf32, #tpu.memory_space<vmem>>, %arg4: memref<2x8xf32, #tpu.memory_space<vmem>>) attributes {dimension_semantics = [#tpu.dimension_semantics<parallel>], iteration_bounds = array<i64: 1>, scalar_prefetch = 0 : i64, scratch_operands = 0 : i64, tpu.core_type = #tpu.core_type<tc>, window_params = [{transform_indices = @transform_0, window_bounds = array<i64: 2, 8, 32>}, {pipeline_mode = #tpu.pipeline_mode<synchronous>, transform_indices = @transform_1, window_bounds = array<i64: 32, 1>}, {transform_indices = @transform_2, window_bounds = array<i64: 2, 32>}, {transform_indices = @transform_3, window_bounds = array<i64: 2, 8>}]} {
    %c0 = arith.constant 0 : index
    %c0_0 = arith.constant 0 : index
    %c0_1 = arith.constant 0 : index
    %0 = vector.load %arg1[%c0, %c0_0, %c0_1] : memref<2x8x32xf32, #tpu.memory_space<vmem>>, vector<2x8x32xf32>
    %c0_2 = arith.constant 0 : index
    %c0_3 = arith.constant 0 : index
    %1 = vector.load %arg2[%c0_2, %c0_3] : memref<32x1xf32, #tpu.memory_space<vmem>>, vector<32x1xf32>
    %2 = math.tanh %0 : vector<2x8x32xf32>
    %3 = vector.shape_cast %2 : vector<2x8x32xf32> to vector<16x32xf32>
    %cst = arith.constant dense<0.000000e+00> : vector<16x1xf32>
    %4 = tpu.matmul %3, %1, %cst {dimension_numbers = #tpu.dot_dimension_numbers<[1], [0], [0], [1], [0, 0, 1, 1], [], []>} : vector<16x32xf32>, vector<32x1xf32>, vector<16x1xf32> -> vector<16x1xf32>
    %5 = vector.shape_cast %4 : vector<16x1xf32> to vector<2x8x1xf32>
    %cst_4 = arith.constant dense<0xFF800000> : vector<2x1xf32>
    %6 = vector.multi_reduction <maximumf>, %5, %cst_4 [1] : vector<2x8x1xf32> to vector<2x1xf32>
    %7 = vector.shape_cast %6 : vector<2x1xf32> to vector<2x1x1xf32>
    %8 = vector.broadcast %7 : vector<2x1x1xf32> to vector<2x8x1xf32>
    %9 = arith.subf %5, %8 : vector<2x8x1xf32>
    %10 = math.exp %9 : vector<2x8x1xf32>
    %cst_5 = arith.constant dense<0.000000e+00> : vector<2x1xf32>
    %11 = vector.multi_reduction <add>, %10, %cst_5 [1] : vector<2x8x1xf32> to vector<2x1xf32>
    %12 = vector.shape_cast %11 : vector<2x1xf32> to vector<2x1x1xf32>
    %13 = tpu.reciprocal %12 {approx = true} : vector<2x1x1xf32> -> vector<2x1x1xf32>
    %14 = arith.mulf %12, %13 : vector<2x1x1xf32>
    %cst_6 = arith.constant 2.000000e+00 : f32
    %15 = vector.broadcast %cst_6 : f32 to vector<2x1x1xf32>
    %16 = arith.subf %15, %14 : vector<2x1x1xf32>
    %17 = arith.mulf %13, %16 : vector<2x1x1xf32>
    %18 = vector.broadcast %17 : vector<2x1x1xf32> to vector<2x8x1xf32>
    %19 = arith.mulf %10, %18 : vector<2x8x1xf32>
    %20 = vector.broadcast %19 : vector<2x8x1xf32> to vector<2x8x32xf32>
    %21 = arith.mulf %0, %20 : vector<2x8x32xf32>
    %cst_7 = arith.constant dense<0.000000e+00> : vector<2x32xf32>
    %22 = vector.multi_reduction <add>, %21, %cst_7 [1] : vector<2x8x32xf32> to vector<2x32xf32>
    %c0_8 = arith.constant 0 : index
    %c0_9 = arith.constant 0 : index
    %23 = vector.load %arg3[%c0_8, %c0_9] : memref<2x32xf32, #tpu.memory_space<vmem>>, vector<2x32xf32>
    tpu.vector_store %arg3[%c0_8, %c0_9], %22 {strides = array<i32>} : memref<2x32xf32, #tpu.memory_space<vmem>>, vector<2x32xf32>,
    %24 = vector.shape_cast %19 : vector<2x8x1xf32> to vector<2x8xf32>
    %c0_10 = arith.constant 0 : index
    %c0_11 = arith.constant 0 : index
    %25 = vector.load %arg4[%c0_10, %c0_11] : memref<2x8xf32, #tpu.memory_space<vmem>>, vector<2x8xf32>
    tpu.vector_store %arg4[%c0_10, %c0_11], %24 {strides = array<i32>} : memref<2x8xf32, #tpu.memory_space<vmem>>, vector<2x8xf32>,
    return
  }
  func.func @transform_0(%arg0: i32) -> (i32, i32, i32) {
    %c0_i32 = arith.constant 0 : i32
    %c0_i32_0 = arith.constant 0 : i32
    %c0_i32_1 = arith.constant 0 : i32
    return %arg0, %c0_i32, %c0_i32_0 : i32, i32, i32
  }
  func.func @transform_1(%arg0: i32) -> (i32, i32) {
    %c0_i32 = arith.constant 0 : i32
    %c0_i32_0 = arith.constant 0 : i32
    %c0_i32_1 = arith.constant 0 : i32
    return %c0_i32, %c0_i32_0 : i32, i32
  }
  func.func @transform_2(%arg0: i32) -> (i32, i32) {
    %c0_i32 = arith.constant 0 : i32
    %c0_i32_0 = arith.constant 0 : i32
    return %arg0, %c0_i32 : i32, i32
  }
  func.func @transform_3(%arg0: i32) -> (i32, i32) {
    %c0_i32 = arith.constant 0 : i32
    %c0_i32_0 = arith.constant 0 : i32
    return %arg0, %c0_i32 : i32, i32
  }
}

</mosaic_0001>

<bundles_post_ra>
// kernel: tpu_custom_call.1
= control target key start
LH: loop header
LB: loop body
LE: loop exit
PB: predicated region body
PF: predicated region fallthrough
CT: control target
= control target key end

     0   :  { %9 = vsyncpa [#allocation3], 0  ;;  %s399_s0 = inlined_call_operand.vmem [shape: f32[2,8,32], index: 0, kind: input, shape index: {}]   ;;  %s400_s1 = inlined_call_operand.vmem [shape: f32[32,1], index: 1, kind: input, shape index: {}]   ;;  %s401_s2 = inlined_call_operand.hbm [shape: f32[2,32], index: 2, kind: output, shape index: {0}]   ;;  %s402_s3 = inlined_call_operand.hbm [shape: f32[2,8], index: 3, kind: output, shape index: {1}]  }
   0x1   :  { %v17_v0 = vld [vmem:[%s400_s1] sm:$0xff]  ;;  %v18_v1 = vld [vmem:[%s400_s1 + $0x8] sm:$0xff]  ;;  %v19_v2 = vld [vmem:[%s400_s1 + $0x10] sm:$0xff] }
   0x2   :  { %v244_v3 = vpack.c.bf16 %v18_v1, %v17_v0  ;;  %v20_v4 = vld [vmem:[%s400_s1 + $0x18] sm:$0xff]  ;;  %v354_v5 = vld [vmem:[%s399_s0] sm:$0xff]  ;;  %v359_v6 = vld [vmem:[%s399_s0 + $0x8] sm:$0xff] }
   0x3   :  { %v248_v7 = vpack.c.bf16 %v20_v4, %v19_v2  ;;  %256 = vtanh.f32 %v354_v5 }
   0x4   :  { %10 = vsyncpa [#allocation5], 0  ;;  %245 = vmatprep.subr.bf16.mxu0 %v244_v3  ;;  %258 = vtanh.f32 %v359_v6  ;;  %vm23_vm0 = vcmask 261120   ;;  %v316_v10 = vmov 0   ;;  %vm105_vm1 = vcmask 7168   ;;  %s317_s0 = smov [#allocation4]  }
   0x5   :  { %247 = vmatpush3.bf16.msra.mxu0 %v244_v3  ;;  %255 = vset.pattern.permute.xlu0 %v316_v10  ;;  %v183_v57 = vlaneseq  ;;  %s213_s1 = sshll.u32 %s317_s0, 4  ;;  %vm178_vm2 = vcmask 1041409   ;;  %vm195_vm3 = vcmask 58368   ;;  %s214_s1 = int_to_ptr.vmem [resolvable:$true] %s213_s1 }
   0x6   :  { %249 = vmatprep.subr.bf16.mxu0 %v248_v7  ;;  %s268_s24 = scalar_lea.vmem %s214_s1, 32  ;;  %p273_p1 = scmp.lt.s32.totalorder %s214_s1, %s214_s1 }
   0x7   :  { %v184_v58 = vand.u32 127, %v183_v57  ;;  %v186_v59 = vshrl.u32 %v183_v57, 7  ;;  %p269_p0 = scmp.ne.s32.totalorder %s214_s1, %s268_s24  ;;  %p274_p2 = scmp.lt.s32.totalorder %s268_s24, %s268_s24 }
   0x9   :  { %251 = vmatpush3.bf16.msra.mxu0 %v248_v7  ;;  %v187_v61 = vsub.s32 %v184_v58, %v186_v59  ;;  %p275_p3 = por %p274_p2, %p273_p1 }
   0xb   :  { %p276_p4 = pnand %p275_p3, %p269_p0 }
   0xd   :  { %v257_v8 = vpop.eup %256 }
   0xe   :  { %v259_v9 = vpop.eup %258  ;;  %241 = vmatprep.mubr.msk.f32.mxu0 %vm23_vm0, %v257_v8 }
   0xf   :  { %242 = vmatmul.mubr.msk.f32.vlgmr.msra.gmra.mrb[0].mxu0 %vm23_vm0, %v259_v9 }
  0xe2   :  { %v243_v11 = vpop.f32.mrb[0].mxu0 }
  0xe3   :  { %v113_v12 = vsel %vm105_vm1, %v243_v11, -inf  ;;  %v96_v13 = vpop.f32.mrb[1].mxu0 }
  0xe4   :  { %v114_v14 = vrot.slane %v113_v12, 4  ;;  %v106_v15 = vsel %vm105_vm1, %v96_v13, -inf }
  0xe5   :  { %v107_v16 = vrot.slane %v106_v15, 4 }
  0xe6   :  { %v115_v17 = vmax.f32 %v113_v12, %v114_v14 }
  0xe7   :  { %v108_v18 = vmax.f32 %v106_v15, %v107_v16 }
  0xe8   :  { %v116_v19 = vrot.slane %v115_v17, 2 }
  0xe9   :  { %v109_v20 = vrot.slane %v108_v18, 2 }
  0xea   :  { %v117_v21 = vmax.f32 %v115_v17, %v116_v19 }
  0xeb   :  { %v110_v22 = vmax.f32 %v108_v18, %v109_v20 }
  0xec   :  { %v118_v23 = vrot.slane %v117_v21, 1 }
  0xed   :  { %v111_v24 = vrot.slane %v110_v22, 1 }
  0xee   :  { %v119_v25 = vmax.f32 %v117_v21, %v118_v23 }
  0xef   :  { %v112_v26 = vmax.f32 %v110_v22, %v111_v24 }
  0xf0   :  { %v121_v27 = vsub.f32 %v243_v11, %v119_v25 }
  0xf1   :  { %v120_v28 = vsub.f32 %v96_v13, %v112_v26 }
  0xf2   :  { %v124_v29 = vmul.f32 1.442695, %v121_v27 }
  0xf3   :  { %v122_v30 = vmul.f32 1.442695, %v120_v28 }
  0xf4   :  { %260 = vpow2.f32 %v124_v29 }
  0xf5   :  { %262 = vpow2.f32 %v122_v30 }
  0xfe   :  { %v261_v31 = vpop.eup %260 }
  0xff   :  { %v263_v32 = vpop.eup %262  ;;  %v133_v33 = vsel %vm105_vm1, %v261_v31, 0.0 }
 0x100   :  { %v134_v34 = vrot.slane %v133_v33, 4  ;;  %v126_v35 = vsel %vm105_vm1, %v263_v32, 0.0 }
 0x101   :  { %v127_v36 = vrot.slane %v126_v35, 4 }
 0x102   :  { %v135_v37 = vadd.f32 %v134_v34, %v133_v33 }
 0x103   :  { %v128_v38 = vadd.f32 %v127_v36, %v126_v35 }
 0x104   :  { %v136_v39 = vrot.slane %v135_v37, 2 }
 0x105   :  { %v129_v40 = vrot.slane %v128_v38, 2 }
 0x106   :  { %v137_v41 = vadd.f32 %v136_v39, %v135_v37 }
 0x107   :  { %v130_v42 = vadd.f32 %v129_v40, %v128_v38 }
 0x108   :  { %v138_v43 = vrot.slane %v137_v41, 1 }
 0x109   :  { %v131_v44 = vrot.slane %v130_v42, 1 }
 0x10a   :  { %v139_v45 = vadd.f32 %v138_v43, %v137_v41 }
 0x10b   :  { %v132_v46 = vadd.f32 %v131_v44, %v130_v42 }
 0x10c   :  { %264 = vrcp.f32 %v139_v45 }
 0x10d   :  { %266 = vrcp.f32 %v132_v46 }
 0x116   :  { %v265_v47 = vpop.eup %264 }
 0x117   :  { %v267_v48 = vpop.eup %266  ;;  %v143_v49 = vmul.f32 %v265_v47, %v139_v45 }
 0x118   :  { %v142_v50 = vmul.f32 %v267_v48, %v132_v46 }
 0x119   :  { %v145_v52 = vsub.f32 2.0, %v143_v49 }
 0x11a   :  { %v144_v51 = vsub.f32 2.0, %v142_v50 }
 0x11b   :  { %v147_v55 = vmul.f32 %v265_v47, %v145_v52 }
 0x11c   :  { %v146_v53 = vmul.f32 %v267_v48, %v144_v51 }
 0x11d   :  { %v149_v56 = vmul.f32 %v261_v31, %v147_v55 }
 0x11e   :  { %v148_v54 = vmul.f32 %v263_v32, %v146_v53 }
 0x120   :  { %152 = vperm.xlu0 %255, %v148_v54  }
 0x124   :  { %157 = vperm.xlu0 %255, %v149_v56  }
 0x19f   :  { %v153_v60 = vpop.permute.xlu0 %152 }
 0x1a0   :  { %v160_v62 = vmul.f32 %v153_v60, %v354_v5  ;;  %v188_v2 = vrot.slane %v153_v60, %v187_v61 }
 0x1a2   :  { %v162_v63 = vsel %vm23_vm0, %v160_v62, 0.0 }
 0x1a3   :  { %v163_v0 = vrot.slane %v162_v63, 4  ;;  %v158_v1 = vpop.permute.xlu0 %157 }
 0x1a4   :  { %v161_v3 = vmul.f32 %v158_v1, %v359_v6  ;;  %v192_v4 = vrot.slane %v158_v1, %v187_v61 }
 0x1a5   :  { %v164_v7 = vadd.f32 %v163_v0, %v162_v63 }
 0x1a6   :  { %v169_v8 = vsel %vm23_vm0, %v161_v3, 0.0  ;;  %v193_v9 = vsel %vm178_vm2, %v192_v4, %v188_v2 }
 0x1a7   :  { %v165_v10 = vrot.slane %v164_v7, 2  ;;  %v170_v5 = vrot.slane %v169_v8, 4  ;;  %196 = vst.msk [vmem:[#allocation4] sm:$0x3] %vm195_vm3, %v193_v9 }
 0x1a8   :  { %279 = shalt.err (!%p276_p4)
}
 0x1a9   :  { %s280_s27 = scalar_lea.hbm %s402_s3, 32 }
 0x1aa   :  { %p281_p5 = scmp.ne.s32.totalorder %s402_s3, %s280_s27  ;;  %p284_p6 = scmp.lt.u32.totalorder %s280_s27, %s402_s3 }
 0x1ac   :  { %p286_p7 = pnand %p284_p6, %p281_p5 }
 0x1ae   :  { %289 = shalt.err (!%p286_p7)
}
 0x1af   :  { %216 = dma.vmem_to_hbm [thread:$0]  %s214_s1, 32, %s402_s3, [#allocation5]   ;;  %v166_v6 = vadd.f32 %v165_v10, %v164_v7  ;;  %v171_v11 = vadd.f32 %v170_v5, %v169_v8  ;;  %vm181_vm4 = vcmask 254976  }
 0x1b0   :  { %s318_s7 = smov [#allocation2]  }
 0x1b1   :  { %v172_v12 = vrot.slane %v171_v11, 2  ;;  %v167_v14 = vrot.slane %v166_v6, 1  ;;  %s203_s8 = sshll.u32 %s318_s7, 4  ;;  %s204_s8 = int_to_ptr.vmem [resolvable:$true] %s203_s8 }
 0x1b2   :  { %s290_s9 = scalar_lea.vmem %s204_s8, 32  ;;  %p295_p9 = scmp.lt.s32.totalorder %s204_s8, %s204_s8 }
 0x1b3   :  { %v173_v13 = vadd.f32 %v172_v12, %v171_v11  ;;  %v168_v16 = vadd.f32 %v167_v14, %v166_v6  ;;  %p291_p8 = scmp.ne.s32.totalorder %s204_s8, %s290_s9  ;;  %p296_p10 = scmp.lt.s32.totalorder %s290_s9, %s290_s9 }
 0x1b5   :  { %v174_v15 = vrot.slane %v173_v13, 1  ;;  %p297_p11 = por %p296_p10, %p295_p9 }
 0x1b7   :  { %v175_v17 = vadd.f32 %v174_v15, %v173_v13  ;;  %p298_p12 = pnand %p297_p11, %p291_p8 }
 0x1b9   :  { %v179_v18 = vsel %vm178_vm2, %v175_v17, %v168_v16 }
 0x1ba   :  { %182 = vst.msk [vmem:[#allocation2] sm:$0x3] %vm181_vm4, %v179_v18 }
 0x1bb   :  { %301 = shalt.err (!%p298_p12)
}
 0x1bc   :  { %s302_s11 = scalar_lea.hbm %s401_s2, 32 }
 0x1bd   :  { %p303_p13 = scmp.ne.s32.totalorder %s401_s2, %s302_s11  ;;  %p306_p0 = scmp.lt.u32.totalorder %s302_s11, %s401_s2 }
 0x1bf   :  { %p308_p1 = pnand %p306_p0, %p303_p13 }
 0x1c1   :  { %311 = shalt.err (!%p308_p1)
}
 0x1c2   :  { %206 = dma.vmem_to_hbm [thread:$0]  %s204_s8, 32, %s401_s2, [#allocation3]  }
 0x1c3   :  { %312 = dma.done.wait [#allocation3], 32  }
 0x1c4   :  { %313 = vsyncadd [#allocation3], 4294967264 }
 0x1c5   :  { %314 = dma.done.wait [#allocation5], 32  }
 0x1c6   :  { %315 = vsyncadd [#allocation5], 4294967264 }
 0x1c7   :  { %223 = vsyncpa [#allocation3], 1 }
 0x1c8   :  { %224 = vsyncpa [#allocation5], 1 }

</bundles_post_ra>
